<compile_context>
chip_gen: v5e
topology: v5e:2x2
jax: 0.10.0
libtpu: 0.0.40
codegen_flags: <defaults>
</compile_context>

<pallas_src>
import jax
import jax.numpy as jnp
from jax.experimental import pallas as pl
from jax.experimental.pallas import tpu as pltpu


_VMEM_LIMIT = 32 * 1024 * 1024          # safe scoped-VMEM budget on v5e/v6e/v7x
_FUSE_MAX_N = 1024                      # default cutoff for the fused small-N path
_FUSED_VMEM_BUDGET = 20 * 1024 * 1024   # conservative bound for the fused path
_Z_RESIDENT_MAX_BYTES = 8 * 1024 * 1024 # 2 x z bytes must fit to keep z resident


# ---------------------------------------------------------------------------
# Kernels
# ---------------------------------------------------------------------------

def fused_gcn_kernel(adj_ref, x_ref, w1_ref, b1_ref, w2_ref, b2_ref,
                     r_in_ref, r_out_ref, out_ref):
    """Whole 2-layer GCN forward with everything resident in VMEM (small N)."""
    a = adj_ref[...].astype(jnp.float32)          # int8 0/1 -> f32 (exact)
    r_in = r_in_ref[...]
    r_out = r_out_ref[...]

    z1 = jnp.dot(x_ref[...], w1_ref[...],
                 preferred_element_type=jnp.float32) * r_out
    h = jnp.dot(a, z1, preferred_element_type=jnp.float32) * r_in + b1_ref[...]
    h = jnp.maximum(h, 0.0)

    z2 = jnp.dot(h, w2_ref[...], preferred_element_type=jnp.float32) * r_out
    out = jnp.dot(a, z2, preferred_element_type=jnp.float32) * r_in + b2_ref[...]
    out_ref[...] = out.astype(out_ref.dtype)


def feat_transform_kernel(x_ref, w_ref, r_out_ref, z_ref):
    """z = (x @ w) * r_out, bf16 x bf16 -> f32 on the MXU, stored bf16."""
    xw = jnp.dot(x_ref[...], w_ref[...], preferred_element_type=jnp.float32)
    z_ref[...] = (xw * r_out_ref[...]).astype(z_ref.dtype)


def make_aggregate_kernel(apply_relu, resident_tk):
    """out = diag(r_in) @ A @ z + b (optionally ReLU).

    A arrives as int8 tiles and is cast to bf16 in-VMEM before the MXU dot.
    If resident_tk is not None, z_ref holds the FULL z array (constant block
    index) and is sliced per k-step; otherwise z_ref is a (tk, F) tile.
    """
    def aggregate_kernel(r_in_ref, a_ref, z_ref, b_ref, out_ref, acc_ref):
        k = pl.program_id(1)

        @pl.when(k == 0)
        def _():
            acc_ref[...] = jnp.zeros_like(acc_ref)

        if resident_tk is None:
            zk = z_ref[...]
        else:
            start = pl.multiple_of(k * resident_tk, resident_tk)
            zk = z_ref[pl.ds(start, resident_tk), :]

        # int8 -> f32 -> bf16 cast (VPU, free filler); bf16 x bf16 -> f32 MXU.
        a_bf16 = a_ref[...].astype(jnp.float32).astype(jnp.bfloat16)
        acc_ref[...] += jnp.dot(a_bf16, zk, preferred_element_type=jnp.float32)

        @pl.when(k == pl.num_programs(1) - 1)
        def _():
            out = acc_ref[...] * r_in_ref[...] + b_ref[...]
            if apply_relu:
                out = jnp.maximum(out, 0.0)
            out_ref[...] = out.astype(out_ref.dtype)

    return aggregate_kernel


# ---------------------------------------------------------------------------
# pallas_call wrappers
# ---------------------------------------------------------------------------

def gcn_fused(adj_i8, x, w1, b1, w2, b2, r_in, r_out):
    n_pad = adj_i8.shape[0]
    fc_pad = w2.shape[1]
    return pl.pallas_call(
        fused_gcn_kernel,
        out_shape=jax.ShapeDtypeStruct((n_pad, fc_pad), jnp.float32),
        compiler_params=pltpu.CompilerParams(vmem_limit_bytes=_VMEM_LIMIT),
    )(adj_i8, x, w1, b1, w2, b2, r_in, r_out)


def graphconv_transform(x, w, r_out, *, tm):
    n_pad, fin_pad = x.shape
    fout_pad = w.shape[1]
    return pl.pallas_call(
        feat_transform_kernel,
        out_shape=jax.ShapeDtypeStruct((n_pad, fout_pad), jnp.bfloat16),
        grid_spec=pltpu.PrefetchScalarGridSpec(
            num_scalar_prefetch=0,
            grid=(n_pad // tm,),
            in_specs=[pl.BlockSpec((tm, fin_pad), lambda i: (i, 0)),
                      pl.BlockSpec((fin_pad, fout_pad), lambda i: (0, 0)),
                      pl.BlockSpec((tm, 1), lambda i: (i, 0))],
            out_specs=pl.BlockSpec((tm, fout_pad), lambda i: (i, 0)),
        ),
        compiler_params=pltpu.CompilerParams(
            dimension_semantics=("parallel",),
            vmem_limit_bytes=_VMEM_LIMIT),
    )(x, w, r_out)


def graphconv_aggregate(a_i8, z, r_in, b, *, apply_relu, out_dtype, tm, tk):
    n_pad = a_i8.shape[0]
    fout_pad = z.shape[1]

    # Keep the whole z array VMEM-resident across the k-loop when it fits
    # (constant block index -> DMA'd exactly once); otherwise stream per k-tile.
    z_bytes = z.size * z.dtype.itemsize
    z_resident = 2 * z_bytes <= _Z_RESIDENT_MAX_BYTES
    if z_resident:
        z_spec = pl.BlockSpec((n_pad, fout_pad), lambda i, k: (0, 0))
        kernel = make_aggregate_kernel(apply_relu, tk)
    else:
        z_spec = pl.BlockSpec((tk, fout_pad), lambda i, k: (k, 0))
        kernel = make_aggregate_kernel(apply_relu, None)

    return pl.pallas_call(
        kernel,
        out_shape=jax.ShapeDtypeStruct((n_pad, fout_pad), out_dtype),
        grid_spec=pltpu.PrefetchScalarGridSpec(
            num_scalar_prefetch=0,
            grid=(n_pad // tm, n_pad // tk),
            in_specs=[pl.BlockSpec((tm, 1), lambda i, k: (i, 0)),        # r_in
                      pl.BlockSpec((tm, tk), lambda i, k: (i, k)),       # A (int8)
                      z_spec,                                            # z (bf16)
                      pl.BlockSpec((1, fout_pad), lambda i, k: (0, 0))], # bias
            out_specs=pl.BlockSpec((tm, fout_pad), lambda i, k: (i, 0)),
            scratch_shapes=[pltpu.VMEM((tm, fout_pad), jnp.float32)],
        ),
        compiler_params=pltpu.CompilerParams(
            dimension_semantics=("parallel", "arbitrary"),
            vmem_limit_bytes=_VMEM_LIMIT),
    )(r_in, a_i8, z, b)


# ---------------------------------------------------------------------------
# Full forward
# ---------------------------------------------------------------------------

def _round_up(v, m):
    return (v + m - 1) // m * m


def _pad2(a, rows, cols, value=0):
    return jnp.pad(a, ((0, rows - a.shape[0]), (0, cols - a.shape[1])),
                   constant_values=value)


def _tiled_plan(n):
    """n_pad, tm (row tile, >=2 iterations for megacore), tk (A contraction tile)."""
    n_pad = _round_up(n, 512)
    tm = 512
    while tm > 128 and n_pad // tm < 2:
        tm //= 2
    tk = 512
    for cand in (2048, 1024, 512):
        if n_pad % cand == 0:
            tk = cand
            break
    return n_pad, tm, tk


def gcn_forward(adj, x, w1, b1, w2, b2, *, fuse_threshold=_FUSE_MAX_N):
    n, in_feats = x.shape
    h_feats = w1.shape[1]
    num_classes = w2.shape[1]

    fin_pad = _round_up(in_feats, 128)
    fh_pad = _round_up(h_feats, 128)
    fc_pad = _round_up(num_classes, 128)

    # Degree normalization (DGL norm='both', clamp(min=1)); precomputed once.
    deg_in = jnp.maximum(jnp.sum(adj, axis=1), 1.0)    # in-degree of dst (rows)
    deg_out = jnp.maximum(jnp.sum(adj, axis=0), 1.0)   # out-degree of src (cols)

    b1_row = jnp.asarray(b1, jnp.float32).reshape(1, -1)
    b2_row = jnp.asarray(b2, jnp.float32).reshape(1, -1)

    # ---------------- fused single-kernel path (small graphs) ----------------
    n_pad_f = _round_up(max(n, 8), 128)
    fused_vmem = (5 * n_pad_f * n_pad_f
                  + 4 * n_pad_f * (fin_pad + 2 * fh_pad + fc_pad)
                  + 4 * (fin_pad * fh_pad + fh_pad * fc_pad))
    if n <= fuse_threshold and fused_vmem <= _FUSED_VMEM_BUDGET:
        n_pad = n_pad_f
        adj_p = _pad2(adj.astype(jnp.int8), n_pad, n_pad)          # 0/1, exact
        x_p = _pad2(x.astype(jnp.float32), n_pad, fin_pad)
        w1_p = _pad2(w1.astype(jnp.float32), fin_pad, fh_pad)
        w2_p = _pad2(w2.astype(jnp.float32), fh_pad, fc_pad)
        b1_p = _pad2(b1_row, 1, fh_pad)
        b2_p = _pad2(b2_row, 1, fc_pad)
        r_in = _pad2(jax.lax.rsqrt(deg_in)[:, None], n_pad, 1, value=1.0)
        r_out = _pad2(jax.lax.rsqrt(deg_out)[:, None], n_pad, 1, value=1.0)

        out = gcn_fused(adj_p, x_p, w1_p, b1_p, w2_p, b2_p, r_in, r_out)
        return out[:n, :num_classes]

    # ---------------------------- tiled path ---------------------------------
    n_pad, tm, tk = _tiled_plan(n)

    # Cast A to the streaming dtype FIRST, then pad (no f32 padded intermediate).
    adj_p = _pad2(adj.astype(jnp.int8), n_pad, n_pad)              # 0/1, exact
    x_p = _pad2(x.astype(jnp.bfloat16), n_pad, fin_pad)
    w1_p = _pad2(w1.astype(jnp.bfloat16), fin_pad, fh_pad)
    w2_p = _pad2(w2.astype(jnp.bfloat16), fh_pad, fc_pad)
    b1_p = _pad2(b1_row, 1, fh_pad)
    b2_p = _pad2(b2_row, 1, fc_pad)
    r_in = _pad2(jax.lax.rsqrt(deg_in)[:, None], n_pad, 1, value=1.0)
    r_out = _pad2(jax.lax.rsqrt(deg_out)[:, None], n_pad, 1, value=1.0)

    # Layer 1: h = relu( diag(r_in) A (diag(r_out) X W1) + b1 )
    z1 = graphconv_transform(x_p, w1_p, r_out, tm=tm)                     # bf16
    h = graphconv_aggregate(adj_p, z1, r_in, b1_p, apply_relu=True,
                            out_dtype=jnp.bfloat16, tm=tm, tk=tk)         # bf16

    # Layer 2 (reassociated): out = diag(r_in) A (diag(r_out) h W2) + b2
    z2 = graphconv_transform(h, w2_p, r_out, tm=tm)                       # bf16
    out = graphconv_aggregate(adj_p, z2, r_in, b2_p, apply_relu=False,
                              out_dtype=jnp.float32, tm=tm, tk=tk)

    return out[:n, :num_classes]


def gcn_reference(adj, x, w1, b1, w2, b2):
    hp = jax.lax.Precision.HIGHEST
    d_in = jnp.maximum(adj.sum(axis=1, keepdims=True), 1.0)
    d_out = jnp.maximum(adj.sum(axis=0, keepdims=True), 1.0)
    a_norm = adj / jnp.sqrt(d_in) / jnp.sqrt(d_out)
    h = jnp.maximum(
        jnp.dot(jnp.dot(a_norm, x, precision=hp), w1, precision=hp) + b1, 0.0)
    return jnp.dot(jnp.dot(a_norm, h, precision=hp), w2, precision=hp) + b2


if __name__ == "__main__":
    def build_case(key, n, in_feats, h_feats, num_classes):
        k_adj, k_x, k_w1, k_w2 = jax.random.split(key, 4)
        # Synthetic symmetric 0/1 graph with self-loops (dense A[dst, src]).
        rand = jax.random.uniform(k_adj, (n, n))
        adj = (rand + rand.T > 1.2).astype(jnp.float32)
        adj = jnp.maximum(adj, jnp.eye(n, dtype=jnp.float32))
        x = jax.random.normal(k_x, (n, in_feats), dtype=jnp.float32)

        def xavier_uniform(k, fan_in, fan_out):
            limit = (6.0 / (fan_in + fan_out)) ** 0.5
            return jax.random.uniform(k, (fan_in, fan_out), jnp.float32,
                                      -limit, limit)

        w1 = xavier_uniform(k_w1, in_feats, h_feats)
        b1 = jnp.zeros((1, h_feats), jnp.float32)
        w2 = xavier_uniform(k_w2, h_feats, num_classes)
        b2 = jnp.zeros((1, num_classes), jnp.float32)
        return adj, x, w1, b1, w2, b2

    IN_FEATS, H_FEATS, NUM_CLASSES = 8, 32, 4
    key = jax.random.PRNGKey(0)
    k_small, k_med = jax.random.split(key)

    # 1) Small graph -> fused single-kernel path (f32 compute, tight tolerance).
    N = 16
    args = build_case(k_small, N, IN_FEATS, H_FEATS, NUM_CLASSES)
    out = jax.block_until_ready(gcn_forward(*args))
    ref = gcn_reference(*args)
    assert out.shape == (N, NUM_CLASSES)
    assert jnp.allclose(out, ref, atol=1e-2, rtol=1e-2), "fused path mismatch"

    # 2) Medium graph forced through the tiled (int8-A / bf16-feature) path.
    N2 = 700
    args2 = build_case(k_med, N2, IN_FEATS, H_FEATS, NUM_CLASSES)
    out2 = jax.block_until_ready(gcn_forward(*args2, fuse_threshold=0))
    ref2 = gcn_reference(*args2)
    assert out2.shape == (N2, NUM_CLASSES)
    assert jnp.allclose(out2, ref2, atol=5e-2, rtol=5e-2), "tiled path mismatch"

    print("KERNEL_OK")
</pallas_src>

<mosaic_0001>
module attributes {stable_mosaic.version = 11 : i64} {
  func.func @fused_gcn_kernel(%arg0: memref<128x128xi8, #tpu.memory_space<vmem>>, %arg1: memref<128x128xf32, #tpu.memory_space<vmem>>, %arg2: memref<128x128xf32, #tpu.memory_space<vmem>>, %arg3: memref<1x128xf32, #tpu.memory_space<vmem>>, %arg4: memref<128x128xf32, #tpu.memory_space<vmem>>, %arg5: memref<1x128xf32, #tpu.memory_space<vmem>>, %arg6: memref<128x1xf32, #tpu.memory_space<vmem>>, %arg7: memref<128x1xf32, #tpu.memory_space<vmem>>, %arg8: memref<128x128xf32, #tpu.memory_space<vmem>>) attributes {dimension_semantics = [], scalar_prefetch = 0 : i64, scratch_operands = 0 : i64, tpu.core_type = #tpu.core_type<tc>} {
    %c0 = arith.constant 0 : index
    %c0_0 = arith.constant 0 : index
    %0 = vector.load %arg0[%c0, %c0_0] : memref<128x128xi8, #tpu.memory_space<vmem>>, vector<128x128xi8>
    %1 = arith.sitofp %0 : vector<128x128xi8> to vector<128x128xf32>
    %c0_1 = arith.constant 0 : index
    %c0_2 = arith.constant 0 : index
    %2 = vector.load %arg6[%c0_1, %c0_2] : memref<128x1xf32, #tpu.memory_space<vmem>>, vector<128x1xf32>
    %c0_3 = arith.constant 0 : index
    %c0_4 = arith.constant 0 : index
    %3 = vector.load %arg7[%c0_3, %c0_4] : memref<128x1xf32, #tpu.memory_space<vmem>>, vector<128x1xf32>
    %c0_5 = arith.constant 0 : index
    %c0_6 = arith.constant 0 : index
    %4 = vector.load %arg1[%c0_5, %c0_6] : memref<128x128xf32, #tpu.memory_space<vmem>>, vector<128x128xf32>
    %c0_7 = arith.constant 0 : index
    %c0_8 = arith.constant 0 : index
    %5 = vector.load %arg2[%c0_7, %c0_8] : memref<128x128xf32, #tpu.memory_space<vmem>>, vector<128x128xf32>
    %cst = arith.constant dense<0.000000e+00> : vector<128x128xf32>
    %6 = tpu.matmul %4, %5, %cst {dimension_numbers = #tpu.dot_dimension_numbers<[1], [0], [0], [1], [0, 0, 1, 1], [], []>} : vector<128x128xf32>, vector<128x128xf32>, vector<128x128xf32> -> vector<128x128xf32>
    %7 = vector.broadcast %3 : vector<128x1xf32> to vector<128x128xf32>
    %8 = arith.mulf %6, %7 : vector<128x128xf32>
    %cst_9 = arith.constant dense<0.000000e+00> : vector<128x128xf32>
    %9 = tpu.matmul %1, %8, %cst_9 {dimension_numbers = #tpu.dot_dimension_numbers<[1], [0], [0], [1], [0, 0, 1, 1], [], []>} : vector<128x128xf32>, vector<128x128xf32>, vector<128x128xf32> -> vector<128x128xf32>
    %10 = vector.broadcast %2 : vector<128x1xf32> to vector<128x128xf32>
    %11 = arith.mulf %9, %10 : vector<128x128xf32>
    %c0_10 = arith.constant 0 : index
    %c0_11 = arith.constant 0 : index
    %12 = vector.load %arg3[%c0_10, %c0_11] : memref<1x128xf32, #tpu.memory_space<vmem>>, vector<1x128xf32>
    %13 = vector.broadcast %12 : vector<1x128xf32> to vector<128x128xf32>
    %14 = arith.addf %11, %13 : vector<128x128xf32>
    %cst_12 = arith.constant 0.000000e+00 : f32
    %15 = vector.broadcast %cst_12 : f32 to vector<128x128xf32>
    %16 = arith.maximumf %14, %15 : vector<128x128xf32>
    %c0_13 = arith.constant 0 : index
    %c0_14 = arith.constant 0 : index
    %17 = vector.load %arg4[%c0_13, %c0_14] : memref<128x128xf32, #tpu.memory_space<vmem>>, vector<128x128xf32>
    %cst_15 = arith.constant dense<0.000000e+00> : vector<128x128xf32>
    %18 = tpu.matmul %16, %17, %cst_15 {dimension_numbers = #tpu.dot_dimension_numbers<[1], [0], [0], [1], [0, 0, 1, 1], [], []>} : vector<128x128xf32>, vector<128x128xf32>, vector<128x128xf32> -> vector<128x128xf32>
    %19 = vector.broadcast %3 : vector<128x1xf32> to vector<128x128xf32>
    %20 = arith.mulf %18, %19 : vector<128x128xf32>
    %cst_16 = arith.constant dense<0.000000e+00> : vector<128x128xf32>
    %21 = tpu.matmul %1, %20, %cst_16 {dimension_numbers = #tpu.dot_dimension_numbers<[1], [0], [0], [1], [0, 0, 1, 1], [], []>} : vector<128x128xf32>, vector<128x128xf32>, vector<128x128xf32> -> vector<128x128xf32>
    %22 = vector.broadcast %2 : vector<128x1xf32> to vector<128x128xf32>
    %23 = arith.mulf %21, %22 : vector<128x128xf32>
    %c0_17 = arith.constant 0 : index
    %c0_18 = arith.constant 0 : index
    %24 = vector.load %arg5[%c0_17, %c0_18] : memref<1x128xf32, #tpu.memory_space<vmem>>, vector<1x128xf32>
    %25 = vector.broadcast %24 : vector<1x128xf32> to vector<128x128xf32>
    %26 = arith.addf %23, %25 : vector<128x128xf32>
    %c0_19 = arith.constant 0 : index
    %c0_20 = arith.constant 0 : index
    %27 = vector.load %arg8[%c0_19, %c0_20] : memref<128x128xf32, #tpu.memory_space<vmem>>, vector<128x128xf32>
    tpu.vector_store %arg8[%c0_19, %c0_20], %26 {strides = array<i32>} : memref<128x128xf32, #tpu.memory_space<vmem>>, vector<128x128xf32>,
    return
  }
}

</mosaic_0001>

<bundles_post_ra>
// kernel: tpu_custom_call.1
= control target key start
LH: loop header
LB: loop body
LE: loop exit
PB: predicated region body
PF: predicated region fallthrough
CT: control target
= control target key end

     0   :  { %13 = vsyncpa [#allocation3], 0  ;;  %s1341_s0 = inlined_call_operand.hbm [shape: s8[128,128], index: 0, kind: input, shape index: {}]   ;;  %s1342_s1 = inlined_call_operand.vmem [shape: f32[128,128], index: 1, kind: input, shape index: {}]   ;;  %s1343_s2 = inlined_call_operand.vmem [shape: f32[128,128], index: 2, kind: input, shape index: {}]   ;;  %s1344_s3 = inlined_call_operand.vmem [shape: f32[1,128], index: 3, kind: input, shape index: {}]   ;;  %s1345_s4 = inlined_call_operand.hbm [shape: f32[128,128], index: 4, kind: input, shape index: {}]   ;;  %s1346_s5 = inlined_call_operand.vmem [shape: f32[1,128], index: 5, kind: input, shape index: {}]   ;;  %s1347_s6 = inlined_call_operand.vmem [shape: f32[128,1], index: 6, kind: input, shape index: {}]   ;;  %s1348_s7 = inlined_call_operand.vmem [shape: f32[128,1], index: 7, kind: input, shape index: {}]   ;;  %s1349_s8 = inlined_call_operand.hbm [shape: f32[128,128], index: 8, kind: output, shape index: {}]  }
   0x1   :  { %14 = vsyncpa [#allocation6], 0 }
   0x2   :  { %15 = vsyncpa [#allocation4], 0  ;;  %s20_s29 = sshll.u32 %s1341_s0, 4  ;;  %s843_s30 = smov [#allocation2]   ;;  %s21_s29 = int_to_ptr.hbm [resolvable:$true] %s20_s29 }
   0x3   :  { %s22_s9 = sshll.u32 %s843_s30, 4  ;;  %s39_s12 = sshll.u32 %s1345_s4, 4  ;;  %s23_s9 = int_to_ptr.vmem [resolvable:$true] %s22_s9  ;;  %s40_s12 = int_to_ptr.hbm [resolvable:$true] %s39_s12 }
   0x4   :  { %s844_s13 = smov 128   ;;  %s845_s14 = smov 8  }
   0x5   :  { %28 = dma.hbm_to_vmem [thread:$0]  %s21_s29, 512, %s23_s9, [#allocation3], %s844_s13, %s844_s13, %s845_s14  }
   0x6   :  { %s846_s15 = smov [#allocation5]  }
   0x7   :  { %s41_s16 = sshll.u32 %s846_s15, 4  ;;  %s42_s16 = int_to_ptr.vmem [resolvable:$true] %s41_s16 }
   0x8   :  { %47 = dma.hbm_to_vmem [thread:$0]  %s40_s12, 2048, %s42_s16, [#allocation6], %s844_s13, %s844_s13, %s845_s14  }
   0x9   :  { %837 = dma.done.wait [#allocation3], 512  }
   0xa   :  { %838 = vsyncadd [#allocation3], 4294966784 }
   0xb   :  { %839 = dma.done.wait [#allocation6], 2048  }
   0xc   :  { %840 = vsyncadd [#allocation6], 4294965248  ;;  %v847_v0 = vmov 0   ;;  %v161_v1 = vld [vmem:[%s1343_s2 + $0x78] sm:$0xff]  ;;  %v160_v2 = vld [vmem:[%s1343_s2 + $0x70] sm:$0xff]  ;;  %s740_s9 = sshll.u32 %s1349_s8, 4  ;;  %s741_s9 = int_to_ptr.hbm [resolvable:$true] %s740_s9 }
   0xd   :  { %760 = vset.pattern.permute.xlu0 %v847_v0  ;;  %761 = vset.pattern.permute.xlu1 %v847_v0  ;;  %v129_v3 = vld [vmem:[%s1348_s7 + $0x78] sm:$0xff]  ;;  %v159_v4 = vld [vmem:[%s1343_s2 + $0x68] sm:$0xff]  ;;  %v158_v5 = vld [vmem:[%s1343_s2 + $0x60] sm:$0xff] }
   0xe   :  { %762 = vset.pattern.permute.xlu2 %v847_v0  ;;  %162 = vmatpush.msra.mxu0 %v161_v1  ;;  %v127_v6 = vld [vmem:[%s1348_s7 + $0x68] sm:$0xff]  ;;  %v157_v7 = vld [vmem:[%s1343_s2 + $0x58] sm:$0xff]  ;;  %v128_v8 = vld [vmem:[%s1348_s7 + $0x70] sm:$0xff] }
   0xf   :  { %304 = vperm.xlu0 %760, %v129_v3   ;;  %294 = vperm.xlu1 %761, %v127_v6   ;;  %v156_v9 = vld [vmem:[%s1343_s2 + $0x50] sm:$0xff]  ;;  %v125_v10 = vld [vmem:[%s1348_s7 + $0x58] sm:$0xff]  ;;  %v155_v11 = vld [vmem:[%s1343_s2 + $0x48] sm:$0xff] }
  0x10   :  { %163 = vmatpush.msra.mxu0 %v160_v2  ;;  %284 = vperm.xlu2 %762, %v125_v10   ;;  %v126_v12 = vld [vmem:[%s1348_s7 + $0x60] sm:$0xff]  ;;  %v153_v14 = vld [vmem:[%s1343_s2 + $0x38] sm:$0xff]  ;;  %v123_v15 = vld [vmem:[%s1348_s7 + $0x48] sm:$0xff] }
  0x11   :  { %v154_v13 = vld [vmem:[%s1343_s2 + $0x40] sm:$0xff]  ;;  %v152_v16 = vld [vmem:[%s1343_s2 + $0x30] sm:$0xff]  ;;  %v151_v18 = vld [vmem:[%s1343_s2 + $0x28] sm:$0xff] }
  0x12   :  { %164 = vmatpush.msra.mxu0 %v159_v4  ;;  %v124_v17 = vld [vmem:[%s1348_s7 + $0x50] sm:$0xff]  ;;  %v122_v19 = vld [vmem:[%s1348_s7 + $0x40] sm:$0xff]  ;;  %v149_v21 = vld [vmem:[%s1343_s2 + $0x18] sm:$0xff] }
  0x13   :  { %v150_v20 = vld [vmem:[%s1343_s2 + $0x20] sm:$0xff]  ;;  %v120_v22 = vld [vmem:[%s1348_s7 + $0x30] sm:$0xff]  ;;  %v121_v24 = vld [vmem:[%s1348_s7 + $0x38] sm:$0xff] }
  0x14   :  { %165 = vmatpush.msra.mxu0 %v158_v5  ;;  %v148_v23 = vld [vmem:[%s1343_s2 + $0x10] sm:$0xff]  ;;  %v147_v25 = vld [vmem:[%s1343_s2 + $0x8] sm:$0xff]  ;;  %v146_v27 = vld [vmem:[%s1343_s2] sm:$0xff] }
  0x15   :  { %v119_v26 = vld [vmem:[%s1348_s7 + $0x28] sm:$0xff]  ;;  %v130_v28 = vld [vmem:[%s1342_s1] sm:$0xff]  ;;  %v117_v29 = vld [vmem:[%s1348_s7 + $0x18] sm:$0xff] }
  0x16   :  { %166 = vmatpush.msra.mxu0 %v157_v7  ;;  %v118_v30 = vld [vmem:[%s1348_s7 + $0x20] sm:$0xff]  ;;  %v116_v31 = vld [vmem:[%s1348_s7 + $0x10] sm:$0xff]  ;;  %v131_v32 = vld [vmem:[%s1342_s1 + $0x8] sm:$0xff] }
  0x17   :  { %299 = vperm.xlu0 %760, %v128_v8   ;;  %289 = vperm.xlu1 %761, %v126_v12   ;;  %v114_v33 = vld [vmem:[%s1348_s7] sm:$0xff]  ;;  %v115_v34 = vld [vmem:[%s1348_s7 + $0x8] sm:$0xff]  ;;  %v132_v35 = vld [vmem:[%s1342_s1 + $0x10] sm:$0xff] }
  0x18   :  { %167 = vmatpush.msra.mxu0 %v156_v9  ;;  %279 = vperm.xlu2 %762, %v124_v17   ;;  %v133_v36 = vld [vmem:[%s1342_s1 + $0x18] sm:$0xff]  ;;  %v134_v37 = vld [vmem:[%s1342_s1 + $0x20] sm:$0xff]  ;;  %v135_v38 = vld [vmem:[%s1342_s1 + $0x28] sm:$0xff] }
  0x19   :  { %v136_v39 = vld [vmem:[%s1342_s1 + $0x30] sm:$0xff]  ;;  %v98_v40 = vld [vmem:[%s1347_s6] sm:$0xff]  ;;  %v137_v41 = vld [vmem:[%s1342_s1 + $0x38] sm:$0xff] }
  0x1a   :  { %168 = vmatpush.msra.mxu0 %v155_v11  ;;  %v100_v42 = vld [vmem:[%s1347_s6 + $0x10] sm:$0xff]  ;;  %v101_v43 = vld [vmem:[%s1347_s6 + $0x18] sm:$0xff]  ;;  %v138_v44 = vld [vmem:[%s1342_s1 + $0x40] sm:$0xff] }
  0x1b   :  { %v103_v45 = vld [vmem:[%s1347_s6 + $0x28] sm:$0xff]  ;;  %v104_v46 = vld [vmem:[%s1347_s6 + $0x30] sm:$0xff]  ;;  %v106_v48 = vld [vmem:[%s1347_s6 + $0x40] sm:$0xff] }
  0x1c   :  { %169 = vmatpush.msra.mxu0 %v154_v13  ;;  %v139_v47 = vld [vmem:[%s1342_s1 + $0x48] sm:$0xff]  ;;  %v140_v50 = vld [vmem:[%s1342_s1 + $0x50] sm:$0xff]  ;;  %v109_v51 = vld [vmem:[%s1347_s6 + $0x58] sm:$0xff] }
  0x1d   :  { %v107_v49 = vld [vmem:[%s1347_s6 + $0x48] sm:$0xff]  ;;  %v110_v52 = vld [vmem:[%s1347_s6 + $0x60] sm:$0xff]  ;;  %v141_v54 = vld [vmem:[%s1342_s1 + $0x58] sm:$0xff] }
  0x1e   :  { %170 = vmatpush.msra.mxu0 %v153_v14  ;;  %v99_v53 = vld [vmem:[%s1347_s6 + $0x8] sm:$0xff]  ;;  %v112_v55 = vld [vmem:[%s1347_s6 + $0x70] sm:$0xff]  ;;  %v113_v56 = vld [vmem:[%s1347_s6 + $0x78] sm:$0xff] }
  0x1f   :  { %274 = vperm.xlu0 %760, %v123_v15   ;;  %269 = vperm.xlu1 %761, %v122_v19   ;;  %v142_v57 = vld [vmem:[%s1342_s1 + $0x60] sm:$0xff]  ;;  %v143_v59 = vld [vmem:[%s1342_s1 + $0x68] sm:$0xff]  ;;  %v105_v60 = vld [vmem:[%s1347_s6 + $0x38] sm:$0xff] }
  0x20   :  { %171 = vmatpush.msra.mxu0 %v152_v16  ;;  %264 = vperm.xlu2 %762, %v121_v24   ;;  %v102_v58 = vld [vmem:[%s1347_s6 + $0x20] sm:$0xff]  ;;  %v144_v61 = vld [vmem:[%s1342_s1 + $0x70] sm:$0xff]  ;;  %v145_v63 = vld [vmem:[%s1342_s1 + $0x78] sm:$0xff] }
  0x21   :  { %v108_v62 = vld [vmem:[%s1347_s6 + $0x50] sm:$0xff]  ;;  %v111_v0 = vld [vmem:[%s1347_s6 + $0x68] sm:$0xff] }
  0x22   :  { %172 = vmatpush.msra.mxu0 %v151_v18 }
  0x24   :  { %173 = vmatpush.msra.mxu0 %v150_v20 }
  0x26   :  { %174 = vmatpush.msra.mxu0 %v149_v21 }
  0x27   :  { %259 = vperm.xlu0 %760, %v120_v22   ;;  %254 = vperm.xlu1 %761, %v119_v26  }
  0x28   :  { %175 = vmatpush.msra.mxu0 %v148_v23  ;;  %249 = vperm.xlu2 %762, %v118_v30  }
  0x2a   :  { %176 = vmatpush.msra.mxu0 %v147_v25 }
  0x2c   :  { %177 = vmatpush.msra.mxu0 %v146_v27 }
  0x2d   :  { %178 = vmatmul.f32.vlgmr.msra.gmra.mxu0 %v130_v28 }
  0x2f   :  { %244 = vperm.xlu0 %760, %v117_v29   ;;  %239 = vperm.xlu1 %761, %v116_v31  }
  0x30   :  { %234 = vperm.xlu2 %762, %v115_v34  }
  0x35   :  { %181 = vmatmul.f32.gmra.mxu0 %v131_v32 }
  0x37   :  { %229 = vperm.xlu0 %760, %v114_v33   ;;  %390 = vperm.xlu1 %761, %v98_v40  }
  0x38   :  { %395 = vperm.xlu2 %762, %v99_v53  }
  0x3d   :  { %184 = vmatmul.f32.gmra.mxu0 %v132_v35 }
  0x3f   :  { %400 = vperm.xlu0 %760, %v100_v42   ;;  %405 = vperm.xlu1 %761, %v101_v43   ;;  %v62_v42 = vld [vmem:[#allocation2] sm:$0xff] }
  0x40   :  { %410 = vperm.xlu2 %762, %v102_v58   ;;  %v63_v58 = vld [vmem:[#allocation2 + $0x8] sm:$0xff] }
  0x45   :  { %187 = vmatmul.f32.gmra.mxu0 %v133_v36 }
  0x47   :  { %415 = vperm.xlu0 %760, %v103_v45   ;;  %420 = vperm.xlu1 %761, %v104_v46   ;;  %v66_v46 = vunpack.c.0.s8 %v62_v42 }
  0x48   :  { %425 = vperm.xlu2 %762, %v105_v60  }
  0x4d   :  { %190 = vmatmul.f32.gmra.mxu0 %v134_v37 }
  0x4f   :  { %430 = vperm.xlu0 %760, %v106_v48   ;;  %435 = vperm.xlu1 %761, %v107_v49  }
  0x50   :  { %440 = vperm.xlu2 %762, %v108_v62  }
  0x55   :  { %193 = vmatmul.f32.gmra.mxu0 %v135_v38 }
  0x57   :  { %445 = vperm.xlu0 %760, %v109_v51   ;;  %450 = vperm.xlu1 %761, %v110_v52   ;;  %v67_v52 = vunpack.c.1.s8 %v62_v42 }
  0x58   :  { %455 = vperm.xlu2 %762, %v111_v0  }
  0x59   :  { %v1152_v53 = vcvt.s32.f32 %v67_v52 }
  0x5d   :  { %196 = vmatmul.f32.gmra.mxu0 %v136_v39 }
  0x5f   :  { %460 = vperm.xlu0 %760, %v112_v55   ;;  %465 = vperm.xlu1 %761, %v113_v56   ;;  %v69_v56 = vunpack.c.3.s8 %v62_v42 }
  0x65   :  { %199 = vmatmul.f32.gmra.mxu0 %v137_v41 }
  0x6a   :  { %v1104_v17 = vpop.permute.xlu2 %284 }
  0x6d   :  { %202 = vmatmul.f32.gmra.mxu0 %v138_v44 }
  0x72   :  { %v1110_v21 = vpop.permute.xlu2 %279 }
  0x75   :  { %205 = vmatmul.f32.gmra.mxu0 %v139_v47 }
  0x7a   :  { %v1119_v28 = vpop.permute.xlu2 %264 }
  0x7d   :  { %208 = vmatmul.f32.gmra.mxu0 %v140_v50  ;;  %v1147_v50 = vcvt.s32.f32 %v66_v46  ;;  %v520_v46 = vld [vmem:[#allocation5] sm:$0xff] }
  0x81   :  { %v1100_v14 = vpop.permute.xlu0 %304  ;;  %v1102_v15 = vpop.permute.xlu1 %294 }
  0x82   :  { %v1130_v36 = vpop.permute.xlu2 %249 }
  0x85   :  { %211 = vmatmul.f32.gmra.mxu0 %v141_v54  ;;  %v68_v54 = vunpack.c.2.s8 %v62_v42  ;;  %v521_v42 = vld [vmem:[#allocation5 + $0x8] sm:$0xff] }
  0x87   :  { %v1155_v55 = vcvt.s32.f32 %v68_v54 }
  0x89   :  { %v1106_v18 = vpop.permute.xlu0 %299  ;;  %v1108_v20 = vpop.permute.xlu1 %289 }
  0x8a   :  { %v1141_v45 = vpop.permute.xlu2 %234 }
  0x8d   :  { %214 = vmatmul.f32.gmra.mxu0 %v142_v57  ;;  %v1158_v57 = vcvt.s32.f32 %v69_v56  ;;  %v1200_v56 = vld [vmem:[%s1344_s3] ss:$0 sm:$0xff] }
  0x91   :  { %v1112_v22 = vpop.permute.xlu0 %274  ;;  %v1116_v26 = vpop.permute.xlu1 %269 }
  0x95   :  { %217 = vmatmul.f32.gmra.mxu0 %v143_v59  ;;  %v70_v59 = vunpack.c.0.s8 %v63_v58 }
  0x97   :  { %v1161_v60 = vcvt.s32.f32 %v70_v59 }
  0x99   :  { %v1122_v30 = vpop.permute.xlu0 %259  ;;  %v1127_v34 = vpop.permute.xlu1 %254 }
  0x9d   :  { %220 = vmatmul.f32.gmra.mxu0 %v144_v61  ;;  %v71_v61 = vunpack.c.1.s8 %v63_v58 }
  0x9f   :  { %v1164_v62 = vcvt.s32.f32 %v71_v61 }
  0xa1   :  { %v1133_v38 = vpop.permute.xlu0 %244  ;;  %v1138_v43 = vpop.permute.xlu1 %239 }
  0xa5   :  { %223 = vmatmul.f32.gmra.mxu0 %v145_v63  ;;  %v72_v63 = vunpack.c.2.s8 %v63_v58 }
  0xa7   :  { %v1167_v0 = vcvt.s32.f32 %v72_v63 }
  0xa9   :  { %v1144_v48 = vpop.permute.xlu0 %229 }
  0xaa   :  { %v1098_v1 = vpop.f32.mrf.mxu0 }
  0xab   :  { %v307_v51 = vmul.f32 %v1144_v48, %v1098_v1  ;;  %v73_v1 = vunpack.c.3.s8 %v63_v58  ;;  %v1202_v58 = vpop.permute.xlu1 %390 }
  0xb2   :  { %v182_v2 = vpop.f32.mrf.mxu0 }
  0xb3   :  { %v308_v49 = vmul.f32 %v1141_v45, %v182_v2  ;;  %v1170_v2 = vcvt.s32.f32 %v73_v1 }
  0xba   :  { %v185_v3 = vpop.f32.mrf.mxu0 }
  0xbb   :  { %v309_v47 = vmul.f32 %v1138_v43, %v185_v3  ;;  %v64_v3 = vld [vmem:[#allocation2 + $0x10] sm:$0xff] }
  0xc2   :  { %v188_v4 = vpop.f32.mrf.mxu0 }
  0xc3   :  { %v310_v44 = vmul.f32 %v1133_v38, %v188_v4  ;;  %v74_v4 = vunpack.c.0.s8 %v64_v3 }
  0xca   :  { %v191_v5 = vpop.f32.mrf.mxu0 }
  0xcb   :  { %v311_v41 = vmul.f32 %v1130_v36, %v191_v5  ;;  %v1173_v5 = vcvt.s32.f32 %v74_v4 }
  0xd2   :  { %v194_v6 = vpop.f32.mrf.mxu0 }
  0xd3   :  { %v312_v40 = vmul.f32 %v1127_v34, %v194_v6  ;;  %v75_v6 = vunpack.c.1.s8 %v64_v3 }
  0xda   :  { %v197_v7 = vpop.f32.mrf.mxu0 }
  0xdb   :  { %v313_v39 = vmul.f32 %v1122_v30, %v197_v7  ;;  %v535_v7 = vld [vmem:[#allocation5 + $0x78] sm:$0xff] }
  0xdc   :  { %536 = vmatpush.msra.mxu2 %v535_v7 }
  0xe2   :  { %v200_v8 = vpop.f32.mrf.mxu0 }
  0xe3   :  { %v314_v37 = vmul.f32 %v1119_v28, %v200_v8  ;;  %v534_v8 = vld [vmem:[#allocation5 + $0x70] sm:$0xff] }
  0xe4   :  { %537 = vmatpush.msra.mxu2 %v534_v8 }
  0xea   :  { %v203_v9 = vpop.f32.mrf.mxu0 }
  0xeb   :  { %v315_v35 = vmul.f32 %v1116_v26, %v203_v9  ;;  %v1176_v9 = vcvt.s32.f32 %v75_v6 }
  0xf2   :  { %v206_v10 = vpop.f32.mrf.mxu0 }
  0xf3   :  { %v316_v33 = vmul.f32 %v1112_v22, %v206_v10  ;;  %v76_v10 = vunpack.c.2.s8 %v64_v3 }
  0xfa   :  { %v209_v11 = vpop.f32.mrf.mxu0 }
  0xfb   :  { %v317_v32 = vmul.f32 %v1110_v21, %v209_v11  ;;  %v533_v11 = vld [vmem:[#allocation5 + $0x68] sm:$0xff] }
  0xfc   :  { %538 = vmatpush.msra.mxu2 %v533_v11 }
 0x102   :  { %v212_v12 = vpop.f32.mrf.mxu0 }
 0x103   :  { %v318_v31 = vmul.f32 %v1104_v17, %v212_v12  ;;  %v532_v12 = vld [vmem:[#allocation5 + $0x60] sm:$0xff] }
 0x104   :  { %539 = vmatpush.msra.mxu2 %v532_v12 }
 0x10a   :  { %v215_v13 = vpop.f32.mrf.mxu0 }
 0x10b   :  { %v319_v29 = vmul.f32 %v1108_v20, %v215_v13  ;;  %v531_v13 = vld [vmem:[#allocation5 + $0x58] sm:$0xff] }
 0x10c   :  { %540 = vmatpush.msra.mxu2 %v531_v13 }
 0x112   :  { %v218_v16 = vpop.f32.mrf.mxu0 }
 0x113   :  { %v320_v27 = vmul.f32 %v1102_v15, %v218_v16  ;;  %v1179_v16 = vcvt.s32.f32 %v76_v10  ;;  %v1210_v10 = vpop.permute.xlu0 %400 }
 0x11a   :  { %v221_v19 = vpop.f32.mrf.mxu0 }
 0x11b   :  { %v321_v25 = vmul.f32 %v1106_v18, %v221_v19  ;;  %v530_v19 = vld [vmem:[#allocation5 + $0x50] sm:$0xff] }
 0x11c   :  { %541 = vmatpush.msra.mxu2 %v530_v19 }
 0x122   :  { %v224_v23 = vpop.f32.mrf.mxu0 }
 0x123   :  { %v322_v24 = vmul.f32 %v1100_v14, %v224_v23  ;;  %v77_v23 = vunpack.c.3.s8 %v64_v3  ;;  %v1206_v3 = vpop.permute.xlu2 %395 }
 0x125   :  { %323 = vmatpush.msra.mxu1 %v322_v24  ;;  %v529_v24 = vld [vmem:[#allocation5 + $0x48] sm:$0xff] }
 0x126   :  { %542 = vmatpush.msra.mxu2 %v529_v24 }
 0x127   :  { %324 = vmatpush.msra.mxu1 %v321_v25  ;;  %v528_v25 = vld [vmem:[#allocation5 + $0x40] sm:$0xff] }
 0x128   :  { %543 = vmatpush.msra.mxu2 %v528_v25 }
 0x129   :  { %325 = vmatpush.msra.mxu1 %v320_v27  ;;  %v527_v27 = vld [vmem:[#allocation5 + $0x38] sm:$0xff] }
 0x12a   :  { %544 = vmatpush.msra.mxu2 %v527_v27 }
 0x12b   :  { %326 = vmatpush.msra.mxu1 %v319_v29  ;;  %v1182_v29 = vcvt.s32.f32 %v77_v23  ;;  %v1214_v23 = vpop.permute.xlu1 %405 }
 0x12d   :  { %327 = vmatpush.msra.mxu1 %v318_v31  ;;  %v526_v31 = vld [vmem:[#allocation5 + $0x30] sm:$0xff] }
 0x12e   :  { %545 = vmatpush.msra.mxu2 %v526_v31 }
 0x12f   :  { %328 = vmatpush.msra.mxu1 %v317_v32  ;;  %v65_v32 = vld [vmem:[#allocation2 + $0x18] sm:$0xff] }
 0x130   :  { %v81_v52 = vunpack.c.3.s8 %v65_v32 }
 0x131   :  { %329 = vmatpush.msra.mxu1 %v316_v33  ;;  %v78_v33 = vunpack.c.0.s8 %v65_v32 }
 0x132   :  { %v1194_v54 = vcvt.s32.f32 %v81_v52 }
 0x133   :  { %330 = vmatpush.msra.mxu1 %v315_v35  ;;  %v525_v35 = vld [vmem:[#allocation5 + $0x28] sm:$0xff]  ;;  %v1226_v52 = vpop.permute.xlu1 %420 }
 0x134   :  { %546 = vmatpush.msra.mxu2 %v525_v35 }
 0x135   :  { %331 = vmatpush.msra.mxu1 %v314_v37  ;;  %v524_v37 = vld [vmem:[#allocation5 + $0x20] sm:$0xff] }
 0x136   :  { %547 = vmatpush.msra.mxu2 %v524_v37 }
 0x137   :  { %332 = vmatpush.msra.mxu1 %v313_v39  ;;  %v1185_v39 = vcvt.s32.f32 %v78_v33 }
 0x139   :  { %333 = vmatpush.msra.mxu1 %v312_v40  ;;  %v523_v40 = vld [vmem:[#allocation5 + $0x18] sm:$0xff] }
 0x13a   :  { %548 = vmatpush.msra.mxu2 %v523_v40 }
 0x13b   :  { %334 = vmatpush.msra.mxu1 %v311_v41  ;;  %v522_v41 = vld [vmem:[#allocation5 + $0x10] sm:$0xff] }
 0x13c   :  { %549 = vmatpush.msra.mxu2 %v522_v41  ;;  %v1222_v41 = vpop.permute.xlu0 %415 }
 0x13d   :  { %335 = vmatpush.msra.mxu1 %v310_v44  ;;  %v79_v44 = vunpack.c.1.s8 %v65_v32 }
 0x13e   :  { %550 = vmatpush.msra.mxu2 %v521_v42 }
 0x13f   :  { %336 = vmatpush.msra.mxu1 %v309_v47  ;;  %v1188_v47 = vcvt.s32.f32 %v79_v44 }
 0x140   :  { %551 = vmatpush.msra.mxu2 %v520_v46 }
 0x141   :  { %337 = vmatpush.msra.mxu1 %v308_v49  ;;  %v80_v49 = vunpack.c.2.s8 %v65_v32  ;;  %v1218_v32 = vpop.permute.xlu2 %410 }
 0x143   :  { %338 = vmatpush.msra.mxu1 %v307_v51  ;;  %v1191_v51 = vcvt.s32.f32 %v80_v49 }
 0x144   :  { %339 = vmatmul.f32.vlgmr.msra.gmra.mxu1 %v1147_v50 }
 0x14c   :  { %342 = vmatmul.f32.gmra.mxu1 %v1152_v53 }
 0x154   :  { %345 = vmatmul.f32.gmra.mxu1 %v1155_v55 }
 0x15c   :  { %348 = vmatmul.f32.gmra.mxu1 %v1158_v57 }
 0x164   :  { %351 = vmatmul.f32.gmra.mxu1 %v1161_v60 }
 0x16c   :  { %354 = vmatmul.f32.gmra.mxu1 %v1164_v62 }
 0x174   :  { %357 = vmatmul.f32.gmra.mxu1 %v1167_v0 }
 0x17c   :  { %360 = vmatmul.f32.gmra.mxu1 %v1170_v2 }
 0x184   :  { %363 = vmatmul.f32.gmra.mxu1 %v1173_v5 }
 0x18c   :  { %366 = vmatmul.f32.gmra.mxu1 %v1176_v9 }
 0x194   :  { %369 = vmatmul.f32.gmra.mxu1 %v1179_v16 }
 0x19c   :  { %372 = vmatmul.f32.gmra.mxu1 %v1182_v29 }
 0x1a4   :  { %375 = vmatmul.f32.gmra.mxu1 %v1185_v39 }
 0x1ac   :  { %378 = vmatmul.f32.gmra.mxu1 %v1188_v47 }
 0x1b4   :  { %381 = vmatmul.f32.gmra.mxu1 %v1191_v51 }
 0x1bc   :  { %384 = vmatmul.f32.gmra.mxu1 %v1194_v54 }
 0x1c1   :  { %v340_v59 = vpop.f32.mrf.mxu1 }
 0x1c2   :  { %v468_v61 = vmul.f32 %v1202_v58, %v340_v59 }
 0x1c4   :  { %v488_v63 = vadd.f32 %v1200_v56, %v468_v61 }
 0x1c6   :  { %v504_v1 = vmax.f32 %v488_v63, 0.0 }
 0x1c8   :  { %552 = vmatmul.f32.vlgmr.msra.gmra.mxu2 %v504_v1 }
 0x1c9   :  { %v343_v4 = vpop.f32.mrf.mxu1 }
 0x1ca   :  { %v469_v6 = vmul.f32 %v1206_v3, %v343_v4  ;;  %v1230_v4 = vpop.permute.xlu2 %425 }
 0x1cc   :  { %v489_v7 = vadd.f32 %v1200_v56, %v469_v6 }
 0x1ce   :  { %v505_v8 = vmax.f32 %v489_v7, 0.0 }
 0x1d0   :  { %555 = vmatmul.f32.gmra.mxu2 %v505_v8 }
 0x1d1   :  { %v346_v11 = vpop.f32.mrf.mxu1 }
 0x1d2   :  { %v470_v12 = vmul.f32 %v1210_v10, %v346_v11 }
 0x1d4   :  { %v490_v13 = vadd.f32 %v1200_v56, %v470_v12  ;;  %v1234_v12 = vpop.permute.xlu0 %430 }
 0x1d6   :  { %v506_v19 = vmax.f32 %v490_v13, 0.0 }
 0x1d8   :  { %558 = vmatmul.f32.gmra.mxu2 %v506_v19 }
 0x1d9   :  { %v349_v24 = vpop.f32.mrf.mxu1 }
 0x1da   :  { %v471_v25 = vmul.f32 %v1214_v23, %v349_v24 }
 0x1dc   :  { %v491_v27 = vadd.f32 %v1200_v56, %v471_v25 }
 0x1de   :  { %v507_v31 = vmax.f32 %v491_v27, 0.0  ;;  %v1238_v27 = vpop.permute.xlu1 %435 }
 0x1df   :  { %1357 = vst [vmem:[#allocation11_spill] sm:$0xff] %v1238_v27 }
 0x1e0   :  { %561 = vmatmul.f32.gmra.mxu2 %v507_v31 }
 0x1e1   :  { %v352_v33 = vpop.f32.mrf.mxu1 }
 0x1e2   :  { %v472_v35 = vmul.f32 %v1218_v32, %v352_v33 }
 0x1e4   :  { %v492_v37 = vadd.f32 %v1200_v56, %v472_v35 }
 0x1e6   :  { %v508_v40 = vmax.f32 %v492_v37, 0.0 }
 0x1e8   :  { %564 = vmatmul.f32.gmra.mxu2 %v508_v40  ;;  %v1242_v40 = vpop.permute.xlu2 %440 }
 0x1e9   :  { %v355_v42 = vpop.f32.mrf.mxu1  ;;  %1358 = vst [vmem:[#allocation12_spill] sm:$0xff] %v1242_v40 }
 0x1ea   :  { %v473_v44 = vmul.f32 %v1222_v41, %v355_v42 }
 0x1ec   :  { %v493_v46 = vadd.f32 %v1200_v56, %v473_v44 }
 0x1ee   :  { %v509_v49 = vmax.f32 %v493_v46, 0.0 }
 0x1f0   :  { %567 = vmatmul.f32.gmra.mxu2 %v509_v49 }
 0x1f1   :  { %v358_v59 = vpop.f32.mrf.mxu1 }
 0x1f2   :  { %v474_v61 = vmul.f32 %v1226_v52, %v358_v59  ;;  %v1246_v59 = vpop.permute.xlu0 %445 }
 0x1f3   :  { %1359 = vst [vmem:[#allocation13_spill] sm:$0xff] %v1246_v59 }
 0x1f4   :  { %v494_v63 = vadd.f32 %v1200_v56, %v474_v61 }
 0x1f6   :  { %v510_v1 = vmax.f32 %v494_v63, 0.0 }
 0x1f8   :  { %570 = vmatmul.f32.gmra.mxu2 %v510_v1 }
 0x1f9   :  { %v361_v6 = vpop.f32.mrf.mxu1 }
 0x1fa   :  { %v475_v7 = vmul.f32 %v1230_v4, %v361_v6 }
 0x1fc   :  { %v495_v8 = vadd.f32 %v1200_v56, %v475_v7  ;;  %v1250_v7 = vpop.permute.xlu1 %450 }
 0x1fd   :  { %1360 = vst [vmem:[#allocation14_spill] sm:$0xff] %v1250_v7 }
 0x1fe   :  { %v511_v11 = vmax.f32 %v495_v8, 0.0 }
 0x200   :  { %573 = vmatmul.f32.gmra.mxu2 %v511_v11 }
 0x201   :  { %v364_v13 = vpop.f32.mrf.mxu1 }
 0x202   :  { %v476_v19 = vmul.f32 %v1234_v12, %v364_v13 }
 0x204   :  { %v496_v24 = vadd.f32 %v1200_v56, %v476_v19 }
 0x206   :  { %v512_v25 = vmax.f32 %v496_v24, 0.0  ;;  %v1254_v24 = vpop.permute.xlu2 %455 }
 0x207   :  { %1361 = vst [vmem:[#allocation15_spill] sm:$0xff] %v1254_v24 }
 0x208   :  { %576 = vmatmul.f32.gmra.mxu2 %v512_v25 }
 0x209   :  { %v367_v31 = vpop.f32.mrf.mxu1 }
 0x20a   :  { %v477_v33 = vmul.f32 %v1238_v27, %v367_v31 }
 0x20c   :  { %v497_v35 = vadd.f32 %v1200_v56, %v477_v33 }
 0x20e   :  { %v513_v37 = vmax.f32 %v497_v35, 0.0 }
 0x210   :  { %579 = vmatmul.f32.gmra.mxu2 %v513_v37  ;;  %v1258_v37 = vpop.permute.xlu0 %460 }
 0x211   :  { %v370_v42 = vpop.f32.mrf.mxu1  ;;  %1362 = vst [vmem:[#allocation16_spill] sm:$0xff] %v1258_v37 }
 0x212   :  { %v478_v44 = vmul.f32 %v1242_v40, %v370_v42 }
 0x214   :  { %v498_v46 = vadd.f32 %v1200_v56, %v478_v44 }
 0x216   :  { %v514_v49 = vmax.f32 %v498_v46, 0.0 }
 0x218   :  { %582 = vmatmul.f32.gmra.mxu2 %v514_v49 }
 0x219   :  { %v373_v61 = vpop.f32.mrf.mxu1 }
 0x21a   :  { %v479_v63 = vmul.f32 %v1246_v59, %v373_v61  ;;  %v1262_v61 = vpop.permute.xlu1 %465 }
 0x21b   :  { %1363 = vst [vmem:[#allocation17_spill] sm:$0xff] %v1262_v61 }
 0x21c   :  { %v499_v1 = vadd.f32 %v1200_v56, %v479_v63 }
 0x21e   :  { %v515_v6 = vmax.f32 %v499_v1, 0.0 }
 0x220   :  { %585 = vmatmul.f32.gmra.mxu2 %v515_v6 }
 0x221   :  { %v376_v8 = vpop.f32.mrf.mxu1 }
 0x222   :  { %v480_v11 = vmul.f32 %v1250_v7, %v376_v8 }
 0x224   :  { %v500_v13 = vadd.f32 %v1200_v56, %v480_v11 }
 0x226   :  { %v516_v19 = vmax.f32 %v500_v13, 0.0 }
 0x228   :  { %588 = vmatmul.f32.gmra.mxu2 %v516_v19 }
 0x229   :  { %v379_v25 = vpop.f32.mrf.mxu1 }
 0x22a   :  { %v481_v31 = vmul.f32 %v1254_v24, %v379_v25 }
 0x22c   :  { %v501_v33 = vadd.f32 %v1200_v56, %v481_v31 }
 0x22e   :  { %v517_v35 = vmax.f32 %v501_v33, 0.0 }
 0x230   :  { %591 = vmatmul.f32.gmra.mxu2 %v517_v35 }
 0x231   :  { %v382_v42 = vpop.f32.mrf.mxu1 }
 0x232   :  { %v482_v44 = vmul.f32 %v1258_v37, %v382_v42 }
 0x234   :  { %v502_v46 = vadd.f32 %v1200_v56, %v482_v44 }
 0x236   :  { %v518_v49 = vmax.f32 %v502_v46, 0.0 }
 0x238   :  { %594 = vmatmul.f32.gmra.mxu2 %v518_v49 }
 0x239   :  { %v385_v63 = vpop.f32.mrf.mxu1 }
 0x23a   :  { %v483_v1 = vmul.f32 %v1262_v61, %v385_v63 }
 0x23c   :  { %v503_v6 = vadd.f32 %v1200_v56, %v483_v1 }
 0x23e   :  { %v519_v8 = vmax.f32 %v503_v6, 0.0 }
 0x240   :  { %597 = vmatmul.f32.gmra.mxu2 %v519_v8 }
 0x24b   :  { %v553_v11 = vpop.f32.mrf.mxu2 }
 0x253   :  { %v556_v13 = vpop.f32.mrf.mxu2 }
 0x25b   :  { %v559_v19 = vpop.f32.mrf.mxu2 }
 0x263   :  { %v562_v25 = vpop.f32.mrf.mxu2 }
 0x26b   :  { %v565_v31 = vpop.f32.mrf.mxu2 }
 0x273   :  { %v568_v33 = vpop.f32.mrf.mxu2 }
 0x27b   :  { %v571_v35 = vpop.f32.mrf.mxu2 }
 0x283   :  { %v574_v42 = vpop.f32.mrf.mxu2 }
 0x28b   :  { %v577_v44 = vpop.f32.mrf.mxu2 }
 0x293   :  { %v580_v46 = vpop.f32.mrf.mxu2 }
 0x294   :  { %v610_v27 = vmul.f32 %v580_v46, %v1112_v22  ;;  %v603_v22 = vmul.f32 %v559_v19, %v1138_v43  ;;  %v1367_v19 = vld [vmem:[#allocation14_spill] sm:$0xff] }
 0x29b   :  { %v583_v49 = vpop.f32.mrf.mxu2 }
 0x29c   :  { %v611_v40 = vmul.f32 %v583_v49, %v1110_v21  ;;  %v604_v21 = vmul.f32 %v562_v25, %v1133_v38  ;;  %v1369_v49 = vld [vmem:[#allocation16_spill] sm:$0xff] }
 0x2a3   :  { %v586_v37 = vpop.f32.mrf.mxu2 }
 0x2a4   :  { %v612_v61 = vmul.f32 %v586_v37, %v1104_v17  ;;  %v605_v17 = vmul.f32 %v565_v31, %v1130_v36 }
 0x2ab   :  { %v589_v24 = vpop.f32.mrf.mxu2 }
 0x2ac   :  { %v613_v8 = vmul.f32 %v589_v24, %v1108_v20  ;;  %v606_v20 = vmul.f32 %v568_v33, %v1127_v34 }
 0x2b3   :  { %v592_v7 = vpop.f32.mrf.mxu2 }
 0x2b4   :  { %v614_v6 = vmul.f32 %v592_v7, %v1102_v15  ;;  %v607_v15 = vmul.f32 %v571_v35, %v1122_v30  ;;  %v1301_v30 = vld [vmem:[%s1346_s5] ss:$0 sm:$0xff]  ;;  %v1365_v7 = vld [vmem:[#allocation12_spill] sm:$0xff]  ;;  %s848_s5 = smov [#allocation7]  }
 0x2b5   :  { %v1368_v35 = vld [vmem:[#allocation15_spill] sm:$0xff]  ;;  %s738_s28 = sshll.u32 %s848_s5, 4  ;;  %s739_s28 = int_to_ptr.vmem [resolvable:$true] %s738_s28 }
 0x2bb   :  { %v595_v59 = vpop.f32.mrf.mxu2 }
 0x2bc   :  { %v615_v1 = vmul.f32 %v595_v59, %v1106_v18  ;;  %v608_v18 = vmul.f32 %v574_v42, %v1119_v28  ;;  %v601_v28 = vmul.f32 %v553_v11, %v1144_v48 }
 0x2c3   :  { %v598_v63 = vpop.f32.mrf.mxu2 }
 0x2c4   :  { %v616_v56 = vmul.f32 %v598_v63, %v1100_v14  ;;  %v609_v14 = vmul.f32 %v577_v44, %v1116_v26  ;;  %v602_v26 = vmul.f32 %v556_v13, %v1141_v45 }
 0x2c6   :  { %617 = vmatpush.msra.mxu3 %v616_v56 }
 0x2c8   :  { %618 = vmatpush.msra.mxu3 %v615_v1 }
 0x2ca   :  { %619 = vmatpush.msra.mxu3 %v614_v6  ;;  %v1370_v6 = vld [vmem:[#allocation17_spill] sm:$0xff] }
 0x2cc   :  { %620 = vmatpush.msra.mxu3 %v613_v8 }
 0x2ce   :  { %621 = vmatpush.msra.mxu3 %v612_v61  ;;  %v1366_v61 = vld [vmem:[#allocation13_spill] sm:$0xff] }
 0x2d0   :  { %622 = vmatpush.msra.mxu3 %v611_v40 }
 0x2d2   :  { %623 = vmatpush.msra.mxu3 %v610_v27  ;;  %v1364_v27 = vld [vmem:[#allocation11_spill] sm:$0xff] }
 0x2d4   :  { %624 = vmatpush.msra.mxu3 %v609_v14 }
 0x2d6   :  { %625 = vmatpush.msra.mxu3 %v608_v18 }
 0x2d8   :  { %626 = vmatpush.msra.mxu3 %v607_v15 }
 0x2da   :  { %627 = vmatpush.msra.mxu3 %v606_v20 }
 0x2dc   :  { %628 = vmatpush.msra.mxu3 %v605_v17 }
 0x2de   :  { %629 = vmatpush.msra.mxu3 %v604_v21 }
 0x2e0   :  { %630 = vmatpush.msra.mxu3 %v603_v22 }
 0x2e2   :  { %631 = vmatpush.msra.mxu3 %v602_v26 }
 0x2e4   :  { %632 = vmatpush.msra.mxu3 %v601_v28 }
 0x2e5   :  { %633 = vmatmul.f32.vlgmr.msra.gmra.mxu3 %v1147_v50 }
 0x2ed   :  { %636 = vmatmul.f32.gmra.mxu3 %v1152_v53 }
 0x2f5   :  { %639 = vmatmul.f32.gmra.mxu3 %v1155_v55 }
 0x2fd   :  { %642 = vmatmul.f32.gmra.mxu3 %v1158_v57 }
 0x305   :  { %645 = vmatmul.f32.gmra.mxu3 %v1161_v60 }
 0x30d   :  { %648 = vmatmul.f32.gmra.mxu3 %v1164_v62 }
 0x315   :  { %651 = vmatmul.f32.gmra.mxu3 %v1167_v0 }
 0x31d   :  { %654 = vmatmul.f32.gmra.mxu3 %v1170_v2 }
 0x325   :  { %657 = vmatmul.f32.gmra.mxu3 %v1173_v5 }
 0x32d   :  { %660 = vmatmul.f32.gmra.mxu3 %v1176_v9 }
 0x335   :  { %663 = vmatmul.f32.gmra.mxu3 %v1179_v16 }
 0x33d   :  { %666 = vmatmul.f32.gmra.mxu3 %v1182_v29 }
 0x345   :  { %669 = vmatmul.f32.gmra.mxu3 %v1185_v39 }
 0x34d   :  { %672 = vmatmul.f32.gmra.mxu3 %v1188_v47 }
 0x355   :  { %675 = vmatmul.f32.gmra.mxu3 %v1191_v51 }
 0x35d   :  { %678 = vmatmul.f32.gmra.mxu3 %v1194_v54 }
 0x368   :  { %v634_v34 = vpop.f32.mrf.mxu3 }
 0x369   :  { %v682_v36 = vmul.f32 %v634_v34, %v1202_v58 }
 0x36b   :  { %v702_v38 = vadd.f32 %v1301_v30, %v682_v36 }
 0x36d   :  { %718 = vst [vmem:[#allocation7] sm:$0xff] %v702_v38 }
 0x370   :  { %v637_v43 = vpop.f32.mrf.mxu3 }
 0x371   :  { %v683_v45 = vmul.f32 %v637_v43, %v1206_v3 }
 0x373   :  { %v703_v48 = vadd.f32 %v1301_v30, %v683_v45 }
 0x375   :  { %719 = vst [vmem:[#allocation7 + $0x8] sm:$0xff] %v703_v48 }
 0x378   :  { %v640_v50 = vpop.f32.mrf.mxu3 }
 0x379   :  { %v684_v53 = vmul.f32 %v640_v50, %v1210_v10 }
 0x37b   :  { %v704_v55 = vadd.f32 %v1301_v30, %v684_v53 }
 0x37d   :  { %720 = vst [vmem:[#allocation7 + $0x10] sm:$0xff] %v704_v55 }
 0x380   :  { %v643_v57 = vpop.f32.mrf.mxu3 }
 0x381   :  { %v685_v60 = vmul.f32 %v643_v57, %v1214_v23 }
 0x383   :  { %v705_v62 = vadd.f32 %v1301_v30, %v685_v60 }
 0x385   :  { %721 = vst [vmem:[#allocation7 + $0x18] sm:$0xff] %v705_v62 }
 0x388   :  { %v646_v0 = vpop.f32.mrf.mxu3 }
 0x389   :  { %v686_v2 = vmul.f32 %v646_v0, %v1218_v32 }
 0x38b   :  { %v706_v5 = vadd.f32 %v1301_v30, %v686_v2 }
 0x38d   :  { %722 = vst [vmem:[#allocation7 + $0x20] sm:$0xff] %v706_v5 }
 0x390   :  { %v649_v9 = vpop.f32.mrf.mxu3 }
 0x391   :  { %v687_v16 = vmul.f32 %v649_v9, %v1222_v41 }
 0x393   :  { %v707_v29 = vadd.f32 %v1301_v30, %v687_v16 }
 0x395   :  { %723 = vst [vmem:[#allocation7 + $0x28] sm:$0xff] %v707_v29 }
 0x398   :  { %v652_v39 = vpop.f32.mrf.mxu3 }
 0x399   :  { %v688_v47 = vmul.f32 %v652_v39, %v1226_v52 }
 0x39b   :  { %v708_v51 = vadd.f32 %v1301_v30, %v688_v47 }
 0x39d   :  { %724 = vst [vmem:[#allocation7 + $0x30] sm:$0xff] %v708_v51 }
 0x3a0   :  { %v655_v54 = vpop.f32.mrf.mxu3 }
 0x3a1   :  { %v689_v58 = vmul.f32 %v655_v54, %v1230_v4 }
 0x3a3   :  { %v709_v3 = vadd.f32 %v1301_v30, %v689_v58 }
 0x3a5   :  { %725 = vst [vmem:[#allocation7 + $0x38] sm:$0xff] %v709_v3 }
 0x3a8   :  { %v658_v10 = vpop.f32.mrf.mxu3 }
 0x3a9   :  { %v690_v23 = vmul.f32 %v658_v10, %v1234_v12 }
 0x3ab   :  { %v710_v32 = vadd.f32 %v1301_v30, %v690_v23 }
 0x3ad   :  { %726 = vst [vmem:[#allocation7 + $0x40] sm:$0xff] %v710_v32 }
 0x3b0   :  { %v661_v41 = vpop.f32.mrf.mxu3 }
 0x3b1   :  { %v691_v40 = vmul.f32 %v661_v41, %v1364_v27 }
 0x3b3   :  { %v711_v52 = vadd.f32 %v1301_v30, %v691_v40 }
 0x3b5   :  { %727 = vst [vmem:[#allocation7 + $0x48] sm:$0xff] %v711_v52 }
 0x3b8   :  { %v664_v59 = vpop.f32.mrf.mxu3 }
 0x3b9   :  { %v692_v24 = vmul.f32 %v664_v59, %v1365_v7 }
 0x3bb   :  { %v712_v4 = vadd.f32 %v1301_v30, %v692_v24 }
 0x3bd   :  { %728 = vst [vmem:[#allocation7 + $0x50] sm:$0xff] %v712_v4 }
 0x3c0   :  { %v667_v37 = vpop.f32.mrf.mxu3 }
 0x3c1   :  { %v693_v11 = vmul.f32 %v667_v37, %v1366_v61 }
 0x3c3   :  { %v713_v12 = vadd.f32 %v1301_v30, %v693_v11 }
 0x3c5   :  { %729 = vst [vmem:[#allocation7 + $0x58] sm:$0xff] %v713_v12 }
 0x3c8   :  { %v670_v13 = vpop.f32.mrf.mxu3 }
 0x3c9   :  { %v694_v25 = vmul.f32 %v670_v13, %v1367_v19 }
 0x3cb   :  { %v714_v31 = vadd.f32 %v1301_v30, %v694_v25 }
 0x3cd   :  { %730 = vst [vmem:[#allocation7 + $0x60] sm:$0xff] %v714_v31 }
 0x3d0   :  { %v673_v33 = vpop.f32.mrf.mxu3 }
 0x3d1   :  { %v695_v42 = vmul.f32 %v673_v33, %v1368_v35 }
 0x3d3   :  { %v715_v44 = vadd.f32 %v1301_v30, %v695_v42 }
 0x3d5   :  { %731 = vst [vmem:[#allocation7 + $0x68] sm:$0xff] %v715_v44 }
 0x3d8   :  { %v676_v46 = vpop.f32.mrf.mxu3 }
 0x3d9   :  { %v696_v63 = vmul.f32 %v676_v46, %v1369_v49 }
 0x3db   :  { %v716_v56 = vadd.f32 %v1301_v30, %v696_v63 }
 0x3dd   :  { %732 = vst [vmem:[#allocation7 + $0x70] sm:$0xff] %v716_v56 }
 0x3e0   :  { %v679_v1 = vpop.f32.mrf.mxu3 }
 0x3e1   :  { %v697_v8 = vmul.f32 %v679_v1, %v1370_v6 }
 0x3e3   :  { %v717_v14 = vadd.f32 %v1301_v30, %v697_v8 }
 0x3e5   :  { %733 = vst [vmem:[#allocation7 + $0x78] sm:$0xff] %v717_v14 }
 0x3e6   :  { %746 = dma.vmem_to_hbm [thread:$0]  %s739_s28, 2048, %s741_s9, [#allocation4], %s844_s13, %s844_s13, %s845_s14  }
 0x3e7   :  { %841 = dma.done.wait [#allocation4], 2048  }
 0x3e8   :  { %842 = vsyncadd [#allocation4], 4294965248 }
 0x3e9   :  { %751 = vsyncpa [#allocation3], 1 }
 0x3ea   :  { %752 = vsyncpa [#allocation6], 1 }
 0x3eb   :  { %753 = vsyncpa [#allocation4], 1 }

</bundles_post_ra>
